<compile_context>
chip_gen: v6e
topology: v6e:2x2x1
jax: 0.10.0
libtpu: 0.0.40
codegen_flags: <defaults>
</compile_context>

<pallas_src>
import functools

import jax
import jax.numpy as jnp
from jax.experimental import pallas as pl
from jax.experimental.pallas import tpu as pltpu


def _simnorm_kernel(x_ref, b_ref, o_ref, *, inv_dim: float):
    x = x_ref[...].astype(jnp.float32)          # (TR, C), lane-dense
    b = b_ref[...]                              # (C, C) bf16 block-diag ones

    # Shift-invariant stabilizer: per-group mean, broadcast to every lane of
    # its group by one MXU matmul against the block-diagonal ones matrix.
    # softmax(x - c) == softmax(x) for any per-group constant c, so the bf16
    # precision of this matmul cancels exactly between numerator/denominator.
    mean = jnp.dot(x.astype(jnp.bfloat16), b,
                   preferred_element_type=jnp.float32) * inv_dim
    # TODO(synk): mean-stabilization assumes per-group dynamic range < ~80 in
    # f32 (true for normalized network activations); for unbounded inputs a
    # true per-group max (segmented reduce) would be required instead.
    e = jnp.exp(x - mean)                       # EUP

    # Per-group sum of e, broadcast back to all lanes, again on the MXU.
    # hi/lo bf16 split keeps the denominator accurate to ~2^-18 relative
    # (a single bf16 pass would only give ~1e-3).
    e_hi = e.astype(jnp.bfloat16)
    e_lo = (e - e_hi.astype(jnp.float32)).astype(jnp.bfloat16)
    denom = (jnp.dot(e_hi, b, preferred_element_type=jnp.float32)
             + jnp.dot(e_lo, b, preferred_element_type=jnp.float32))

    # Approximate reciprocal on the EUP + two Newton-Raphson refinements
    # (2 VALU ops each) -> ~1e-7 relative error, no VPU divide sequence.
    r = pl.reciprocal(denom, approx=True)
    r = r * (2.0 - denom * r)
    r = r * (2.0 - denom * r)
    o_ref[...] = (e * r).astype(o_ref.dtype)


def _choose_layout(total: int, last_dim: int, simnorm_dim: int):
    """Pick a lane-dense 2-D view (rows, c), a row tile, and the grid size."""
    c = 0
    for cand in (128, 256, 384, 512):           # prefer 128: cheapest matmul
        if cand % simnorm_dim == 0 and total % cand == 0:
            c = cand
            break
    if c == 0:
        # Rare fallback (total not a multiple of 128): original last dim.
        # Still correct; stores may be partially masked.
        c = last_dim
    rows = total // c

    # Row tile: multiple of 8, block capped at ~2 MiB f32 so in+out double
    # buffers plus elementwise temps stay well inside VMEM even on v7x
    # (64 MiB physical), and >=4 grid steps for mid/large inputs so the DMA
    # pipeline and both TensorCores have work.
    max_tile = max(8, ((2 * 1024 * 1024) // (4 * c)) // 8 * 8)
    if rows <= 8:
        row_tile = rows                         # tiny input: single block
    else:
        quarter = max(8, (rows // 4) // 8 * 8)  # aim for >=4 grid steps
        row_tile = min(max_tile, quarter)
    grid = int(pl.cdiv(rows, row_tile))
    return rows, c, row_tile, grid


def simnorm(x: jax.Array, simnorm_dim: int = 8) -> jax.Array:
    """Pallas TPU implementation of SimNorm.forward (grouped softmax over the
    last axis, groups of width `simnorm_dim`)."""
    orig_shape = x.shape
    d = orig_shape[-1]
    if d % simnorm_dim != 0:
        raise ValueError("last dim must be divisible by simnorm_dim")

    total = x.size
    rows, c, row_tile, grid = _choose_layout(total, d, simnorm_dim)
    x2 = x.reshape(rows, c)     # pure layout plumbing; groups stay contiguous

    # Block-diagonal ones matrix: (v @ B)[r, j] = sum of v[r] over j's group.
    gid = jnp.arange(c, dtype=jnp.int32) // simnorm_dim
    bmat = (gid[:, None] == gid[None, :]).astype(jnp.bfloat16)

    kernel = functools.partial(_simnorm_kernel, inv_dim=1.0 / simnorm_dim)

    # VMEM limit from actual usage (double-buffered in/out blocks, resident
    # B matrix, generous headroom for elementwise temps), capped below v7x's
    # 64 MiB physical VMEM.
    block_bytes = row_tile * c * 4
    vmem_limit = int(min(48 * 1024 * 1024,
                         max(16 * 1024 * 1024, 16 * block_bytes + c * c * 8)))

    out = pl.pallas_call(
        kernel,
        out_shape=jax.ShapeDtypeStruct((rows, c), x.dtype),
        grid_spec=pltpu.PrefetchScalarGridSpec(
            num_scalar_prefetch=0,
            grid=(grid,),
            in_specs=[
                pl.BlockSpec((row_tile, c), lambda i: (i, 0)),
                pl.BlockSpec((c, c), lambda i: (0, 0)),   # resident constant
            ],
            out_specs=pl.BlockSpec((row_tile, c), lambda i: (i, 0)),
        ),
        compiler_params=pltpu.CompilerParams(
            dimension_semantics=("parallel",),   # shard row grid across TCs
            vmem_limit_bytes=vmem_limit,
        ),
        cost_estimate=pl.CostEstimate(
            flops=total * (6 * c + 12),
            transcendentals=2 * total,
            bytes_accessed=2 * total * x.dtype.itemsize + c * c * 2,
        ),
    )(x2, bmat)

    return out.reshape(orig_shape)


def simnorm_ref(x: jax.Array, simnorm_dim: int = 8) -> jax.Array:
    shape = x.shape
    xg = x.reshape(*shape[:-1], -1, simnorm_dim)
    return jax.nn.softmax(xg, axis=-1).reshape(shape)


if __name__ == "__main__":
    key = jax.random.PRNGKey(0)
    # Small shape consistent with the module: (batch=2, channels=4, seq=16, hidden=32)
    x = jax.random.normal(key, (2, 4, 16, 32), dtype=jnp.float32)

    out = jax.block_until_ready(simnorm(x, simnorm_dim=8))
    ref = simnorm_ref(x, simnorm_dim=8)

    assert out.shape == x.shape and out.dtype == x.dtype
    assert jnp.allclose(out, ref, atol=1e-5, rtol=1e-5), "mismatch vs reference"

    print("KERNEL_OK")
</pallas_src>

<mosaic_0001>
module attributes {stable_mosaic.version = 11 : i64} {
  func.func @_simnorm_kernel(%arg0: i32, %arg1: memref<8x128xf32, #tpu.memory_space<vmem>>, %arg2: memref<128x128xbf16, #tpu.memory_space<vmem>>, %arg3: memref<8x128xf32, #tpu.memory_space<vmem>>) attributes {dimension_semantics = [#tpu.dimension_semantics<parallel>], iteration_bounds = array<i64: 4>, scalar_prefetch = 0 : i64, scratch_operands = 0 : i64, tpu.core_type = #tpu.core_type<tc>, window_params = [{transform_indices = @transform_0, window_bounds = array<i64: 8, 128>}, {pipeline_mode = #tpu.pipeline_mode<synchronous>, transform_indices = @transform_1, window_bounds = array<i64: 128, 128>}, {transform_indices = @transform_2, window_bounds = array<i64: 8, 128>}]} {
    %c0 = arith.constant 0 : index
    %c0_0 = arith.constant 0 : index
    %0 = vector.load %arg1[%c0, %c0_0] : memref<8x128xf32, #tpu.memory_space<vmem>>, vector<8x128xf32>
    %c0_1 = arith.constant 0 : index
    %c0_2 = arith.constant 0 : index
    %1 = vector.load %arg2[%c0_1, %c0_2] : memref<128x128xbf16, #tpu.memory_space<vmem>>, vector<128x128xbf16>
    %2 = arith.truncf %0 : vector<8x128xf32> to vector<8x128xbf16>
    %cst = arith.constant dense<0.000000e+00> : vector<8x128xf32>
    %3 = tpu.matmul %2, %1, %cst {dimension_numbers = #tpu.dot_dimension_numbers<[1], [0], [0], [1], [0, 0, 1, 1], [], []>} : vector<8x128xbf16>, vector<128x128xbf16>, vector<8x128xf32> -> vector<8x128xf32>
    %cst_3 = arith.constant 1.250000e-01 : f32
    %4 = vector.broadcast %cst_3 : f32 to vector<8x128xf32>
    %5 = arith.mulf %3, %4 : vector<8x128xf32>
    %6 = arith.subf %0, %5 : vector<8x128xf32>
    %7 = math.exp %6 : vector<8x128xf32>
    %8 = arith.truncf %7 : vector<8x128xf32> to vector<8x128xbf16>
    %9 = arith.extf %8 : vector<8x128xbf16> to vector<8x128xf32>
    %10 = arith.subf %7, %9 : vector<8x128xf32>
    %11 = arith.truncf %10 : vector<8x128xf32> to vector<8x128xbf16>
    %cst_4 = arith.constant dense<0.000000e+00> : vector<8x128xf32>
    %12 = tpu.matmul %8, %1, %cst_4 {dimension_numbers = #tpu.dot_dimension_numbers<[1], [0], [0], [1], [0, 0, 1, 1], [], []>} : vector<8x128xbf16>, vector<128x128xbf16>, vector<8x128xf32> -> vector<8x128xf32>
    %cst_5 = arith.constant dense<0.000000e+00> : vector<8x128xf32>
    %13 = tpu.matmul %11, %1, %cst_5 {dimension_numbers = #tpu.dot_dimension_numbers<[1], [0], [0], [1], [0, 0, 1, 1], [], []>} : vector<8x128xbf16>, vector<128x128xbf16>, vector<8x128xf32> -> vector<8x128xf32>
    %14 = arith.addf %12, %13 : vector<8x128xf32>
    %15 = tpu.reciprocal %14 {approx = true} : vector<8x128xf32> -> vector<8x128xf32>
    %16 = arith.mulf %14, %15 : vector<8x128xf32>
    %cst_6 = arith.constant 2.000000e+00 : f32
    %17 = vector.broadcast %cst_6 : f32 to vector<8x128xf32>
    %18 = arith.subf %17, %16 : vector<8x128xf32>
    %19 = arith.mulf %15, %18 : vector<8x128xf32>
    %20 = arith.mulf %14, %19 : vector<8x128xf32>
    %cst_7 = arith.constant 2.000000e+00 : f32
    %21 = vector.broadcast %cst_7 : f32 to vector<8x128xf32>
    %22 = arith.subf %21, %20 : vector<8x128xf32>
    %23 = arith.mulf %19, %22 : vector<8x128xf32>
    %24 = arith.mulf %7, %23 : vector<8x128xf32>
    %c0_8 = arith.constant 0 : index
    %c0_9 = arith.constant 0 : index
    %25 = vector.load %arg3[%c0_8, %c0_9] : memref<8x128xf32, #tpu.memory_space<vmem>>, vector<8x128xf32>
    tpu.vector_store %arg3[%c0_8, %c0_9], %24 {strides = array<i32>} : memref<8x128xf32, #tpu.memory_space<vmem>>, vector<8x128xf32>,
    return
  }
  func.func @transform_0(%arg0: i32) -> (i32, i32) {
    %c0_i32 = arith.constant 0 : i32
    %c0_i32_0 = arith.constant 0 : i32
    return %arg0, %c0_i32 : i32, i32
  }
  func.func @transform_1(%arg0: i32) -> (i32, i32) {
    %c0_i32 = arith.constant 0 : i32
    %c0_i32_0 = arith.constant 0 : i32
    %c0_i32_1 = arith.constant 0 : i32
    return %c0_i32, %c0_i32_0 : i32, i32
  }
  func.func @transform_2(%arg0: i32) -> (i32, i32) {
    %c0_i32 = arith.constant 0 : i32
    %c0_i32_0 = arith.constant 0 : i32
    return %arg0, %c0_i32 : i32, i32
  }
}

</mosaic_0001>

<bundles_post_ra>
// kernel: tpu_custom_call.1
= control target key start
LH: loop header
LB: loop body
LE: loop exit
PB: predicated region body
PF: predicated region fallthrough
CT: control target
= control target key end

     0   :  { %7 = vsyncpa [#allocation3], 0  ;;  %s962_s0 = inlined_call_operand.hbm [shape: f32[32,128], index: 0, kind: input, shape index: {}]   ;;  %s963_s1 = inlined_call_operand.hbm [shape: bf16[128,128], index: 1, kind: input, shape index: {}]   ;;  %s964_s2 = inlined_call_operand.hbm [shape: f32[32,128], index: 2, kind: output, shape index: {}]  }
   0x1   :  { %9 = vsyncpa [#allocation3 + $0x1], 0 }
   0x2   :  { %10 = vsyncpa [#allocation6], 0 }
   0x3   :  { %11 = vsyncpa [#allocation4], 0 }
   0x4   :  { %13 = vsyncpa [#allocation4 + $0x1], 0  ;;  %s800_s9 = smov 0   ;;  %s802_s10 = smov 0  }
   0x5   :  { %s804_s11 = smov 0   ;;  %s806_s12 = smov 0  }
   0x6 LB: > { %s821_s13 = sadd.s32 4294967295, %s776_s12   ;;  %s472_s14 = sadd.s32 4294967294, %s776_s12   ;;  %s776_s12 = sphi %s806_s12, %s985_s12   ;;  %s772_s11 = sphi %s804_s11, %s984_s11   ;;  %s768_s10 = sphi %s802_s10, %s983_s10   ;;  %s764_s9 = sphi %s800_s9, %s982_s9  }
   0x7   : > { %p39_p0 = scmp.ne.s32.totalorder %s768_s10, %s764_s9  ;;  %p965_p1 = scmp.eq.s32.totalorder %s821_s13, 0 }
   0x8   : > { %p90_p3 = scmp.eq.s32.totalorder %s472_s14, 3  ;;  %p473_p5 = scmp.ge.s32.totalorder %s776_s12, 1 }
   0x9   : > { %p830_p4 = por %p965_p1, %p39_p0  ;;  %p97_p7 = scmp.lt.s32.totalorder %s776_s12, 5 }
   0xa   : > { %p835_p6 = por %p90_p3, %p39_p0  ;;  %s778_s18 = smov [#allocation5]  }
   0xb   : > { %s969_s15 = scalar_select %p830_p4, 1, 0 }
   0xc   : > { %s970_s16 = scalar_select %p835_p6, 1, 0 }
   0xd   : > { %p840_p8 = pnand %p473_p5, %p97_p7  ;;  %s109_s19 = sshll.u32 %s778_s18, 4  ;;  %s110_s19 = int_to_ptr.vmem [resolvable:$true] %s109_s19 }
   0xe   : > { %s853_s21 = sadd.s32 1, %s776_s12   ;;  %s26_s22 = sadd.s32 1, %s772_s11 }
   0xf   : > { %s971_s17 = scalar_select %p840_p8, 1, 0 }
  0x10   : > { %p589_p9 = pneg %p840_p8  ;;  %s23_s23 = ssub.s32 %s776_s12, %s853_s21 }
  0x11   : > { %s665_s24 = scalar_lea.vmem %s110_s19, 1024  ;;  %p673_p3 = scmp.lt.s32.totalorder %s110_s19, %s110_s19 }
  0x12   : > { %p848_p10 = pnand %p589_p9, %p965_p1  ;;  %p666_p12 = scmp.ne.s32.totalorder %s110_s19, %s665_s24 }
  0x13   : > { %p674_p5 = scmp.lt.s32.totalorder %s665_s24, %s665_s24 }
  0x14   : > { %p656_p11 = pneg %p848_p10 }
  0x15   : > { %p675_p7 = por %p674_p5, %p673_p3 }
  0x16   : > { %p668_p13 = pnand %p666_p12, %p656_p11 }
  0x18   : > { %p669_p0 = pneg %p668_p13 }
  0x1a   : > { %p676_p2 = pnand %p675_p7, %p669_p0 }
  0x1c   : > { %679 = shalt.err (!%p676_p2)
}
  0x1d   : > { %s779_s25 = smov 64   ;;  %s780_s26 = smov 4  }
  0x1e   : > { %592 = dma.hbm_to_vmem [thread:$0]  (!%p848_p10), %s963_s1, 1024, %s110_s19, [#allocation6], %s779_s25, %s779_s25, %s780_s26  }
  0x1f   : > { %p24_p9 = scmp.eq.s32.totalorder %s23_s23, 0  ;;  %p33_p11 = scmp.ne.s32.totalorder %s772_s11, %s768_s10 }
  0x20   : > { %p34_p12 = scmp.eq.s32.totalorder %s776_s12, 0  ;;  %p602_p2 = scmp.lt.s32.totalorder %s776_s12, 4 }
  0x21   : > { %s870_s29 = scalar_select %p24_p9, %s772_s11, %s26_s22  }
  0x22   : > { %p35_p13 = por %p34_p12, %p33_p11  ;;  %p973_p0 = scmp.eq.s32.totalorder %s821_s13, 3 }
  0x23   : > { %s123_s3 = sand.u32 1, %s772_s11   ;;  %s477_s4 = sshll.u32 %s776_s12, 7 }
  0x24   : > { %p874_p3 = por %p973_p0, %p33_p11  ;;  %s476_s5 = sshll.u32 %s123_s3, 3 }
  0x25   : > { %s883_s8 = scalar_lea.hbm %s962_s0, %s477_s4  ;;  %s127_s14 = scalar_lea.vmem [#allocation2], %s476_s5 }
  0x26   : > { %s974_s30 = scalar_select %p874_p3, 1, 0 }
  0x27   : > { %s134_s18 = sshll.u32 %s127_s14, 4  ;;  %p885_p10 = pnand %p602_p2, %p35_p13  ;;  %s135_s18 = int_to_ptr.vmem [resolvable:$true] %s134_s18 }
  0x28   : > { %s124_s20 = scalar_lea.sflag [#allocation3], %s123_s3  ;;  %s680_s22 = scalar_lea.hbm %s883_s8, 128 }
  0x29   : > { %p681_p5 = scmp.ne.s32.totalorder %s883_s8, %s680_s22  ;;  %p682_p7 = pneg %p885_p10 }
  0x2a   : > { %s685_s25 = scalar_lea.hbm %s962_s0, 512  ;;  %p686_p12 = scmp.lt.s32.totalorder %s883_s8, %s962_s0 }
  0x2b   : > { %p683_p9 = pnand %p682_p7, %p681_p5  ;;  %p687_p2 = scmp.lt.s32.totalorder %s685_s25, %s680_s22 }
  0x2d   : > { %p684_p11 = pneg %p683_p9  ;;  %p688_p13 = por %p687_p2, %p686_p12 }
  0x2f   : > { %p689_p0 = pnand %p688_p13, %p684_p11 }
  0x31   : > { %692 = shalt.err (!%p689_p0)
}
  0x32   : > { %s693_s28 = scalar_lea.vmem %s135_s18, 128  ;;  %s781_s3 = smov [#allocation2]  }
  0x33   : > { %p694_p1 = scmp.ne.s32.totalorder %s135_s18, %s693_s28  ;;  %s698_s4 = sshll.u32 %s781_s3, 4  ;;  %s699_s4 = int_to_ptr.vmem [resolvable:$false] %s698_s4 }
  0x34   : > { %s700_s5 = scalar_lea.vmem %s699_s4, 256  ;;  %p701_p5 = scmp.lt.s32.totalorder %s135_s18, %s699_s4 }
  0x35   : > { %p696_p6 = pnand %p694_p1, %p682_p7  ;;  %p702_p9 = scmp.lt.s32.totalorder %s700_s5, %s693_s28 }
  0x37   : > { %p697_p3 = pneg %p696_p6  ;;  %p703_p4 = por %p702_p9, %p701_p5 }
  0x39   : > { %p704_p8 = pnand %p703_p4, %p697_p3 }
  0x3b   : > { %707 = shalt.err (!%p704_p8)
}
  0x3c   : > { %596 = dma.hbm_to_vmem [thread:$0]  (!%p885_p10), %s883_s8, 128, %s135_s18, %s124_s20  }
  0x3d   : > { %p976_p11 = scmp.ne.s32.totalorder %s971_s17, 0 }
  0x3e   : > { %s906_s6 = sand.u32 (!%p976_p11), 1, %s768_s10   ;;  %p977_p1 = scmp.ne.s32.totalorder (!%p976_p11), %s969_s15, 0 }
  0x3f   : > { %143 = sbr.rel (%p976_p11) target bundleno = 563 (0x233), region = 28  ;;  %s479_s7 = sshll.u32 (!%p976_p11), %s906_s6, 3 }
  0x40   : > { %s146_s14 = scalar_lea.sflag (!%p976_p11), [#allocation3], %s906_s6  ;;  %s912_s22 = scalar_lea.vmem (!%p976_p11), [#allocation2], %s479_s7 }
  0x44   : > { %751 = dma.done.wait (%p977_p1), %s146_s14, 128  }
  0x45   : > { %753 = vsyncadd (%p977_p1), %s146_s14, 4294967168  ;;  %p978_p4 = scmp.eq.s32.totalorder %s821_s13, 0 }
  0x47   : > { %755 = dma.done.wait (%p978_p4), [#allocation6], 1024   ;;  %p979_p6 = pmov %p978_p4 }
  0x48   : > { %v782_v0 = vmov 0.0   ;;  %vm783_vm0 = vmmov 0   ;;  %v642_v1 = vld [vmem:[#allocation5 + $0x38] sm:$0xff]   ;;  %v643_v2 = vld [vmem:[#allocation5 + $0x30] sm:$0xff]   ;;  %v644_v3 = vld [vmem:[#allocation5 + $0x28] sm:$0xff]   ;;  %s491_s15 = sshll.u32 %s821_s13, 7 }
  0x49   : > { %757 = vsyncadd (%p979_p6), [#allocation6], 4294966272  ;;  %521 = vmatprep.subr.bf16.mxu0 %v782_v0  ;;  %537 = vmatprep.mubr.msk.bf16.mxu0 %vm783_vm0, %v782_v0  ;;  %v645_v4 = vld [vmem:[#allocation5 + $0x20] sm:$0xff]   ;;  %v646_v5 = vld [vmem:[#allocation5 + $0x18] sm:$0xff]   ;;  %s173_s17 = scalar_lea.vmem [#allocation7], %s479_s7  ;;  %s390_s20 = scalar_lea.hbm %s964_s2, %s491_s15 }
  0x4a   : > { %541 = vmatprep.subr.bf16.mxu1 %v782_v0  ;;  %557 = vmatprep.mubr.msk.bf16.mxu1 %vm783_vm0, %v782_v0  ;;  %v647_v6 = vld [vmem:[#allocation5 + $0x10] sm:$0xff]   ;;  %v648_v7 = vld [vmem:[#allocation5 + $0x8] sm:$0xff]   ;;  %v649_v8 = vld [vmem:[#allocation5] sm:$0xff]   ;;  %s392_s8 = sshll.u32 %s173_s17, 4  ;;  %s379_s23 = scalar_lea.sflag [#allocation4], %s906_s6  ;;  %s393_s8 = int_to_ptr.vmem [resolvable:$true] %s392_s8 }
  0x4b   : > { %522 = vmatpush3.bf16.msra.mxu0 %v642_v1  ;;  %542 = vmatpush3.bf16.msra.mxu1 %v642_v1  ;;  %v175_v9 = vld [vmem:[%s912_s22] sm:$0xff]  ;;  %s708_s24 = scalar_lea.vmem %s393_s8, 128  ;;  %p980_p3 = scmp.ne.s32.totalorder %s974_s30, 0 }
  0x4c   : > { %523 = vmatprep.subr.bf16.mxu0 %v782_v0  ;;  %543 = vmatprep.subr.bf16.mxu1 %v782_v0  ;;  %v192_v10 = vpack.c.bf16 %v175_v9, %v175_v9  ;;  %p709_p8 = scmp.ne.s32.totalorder %s393_s8, %s708_s24  ;;  %s784_s25 = smov [#allocation7]  }
  0x4d   : > { %s712_s26 = sshll.u32 %s784_s25, 4  ;;  %s713_s26 = int_to_ptr.vmem [resolvable:$false] %s712_s26 }
  0x4e   : > { %p710_p10 = pnand %p709_p8, %p980_p3  ;;  %s714_s13 = scalar_lea.vmem %s713_s26, 256 }
  0x4f   : > { %524 = vmatpush3.bf16.msra.mxu0 %v643_v2  ;;  %544 = vmatpush3.bf16.msra.mxu1 %v643_v2  ;;  %p715_p12 = scmp.lt.s32.totalorder %s393_s8, %s713_s26  ;;  %p716_p2 = scmp.lt.s32.totalorder %s714_s13, %s708_s24 }
  0x50   : > { %525 = vmatprep.subr.bf16.mxu0 %v782_v0  ;;  %545 = vmatprep.subr.bf16.mxu1 %v782_v0  ;;  %p711_p7 = pneg %p710_p10 }
  0x51   : > { %p717_p13 = por %p716_p2, %p715_p12 }
  0x53   : > { %526 = vmatpush3.bf16.msra.mxu0 %v644_v3  ;;  %546 = vmatpush3.bf16.msra.mxu1 %v644_v3  ;;  %p718_p0 = pnand %p717_p13, %p711_p7 }
  0x54   : > { %527 = vmatprep.subr.bf16.mxu0 %v782_v0  ;;  %547 = vmatprep.subr.bf16.mxu1 %v782_v0 }
  0x57   : > { %528 = vmatpush3.bf16.msra.mxu0 %v645_v4  ;;  %548 = vmatpush3.bf16.msra.mxu1 %v645_v4 }
  0x58   : > { %529 = vmatprep.subr.bf16.mxu0 %v782_v0  ;;  %549 = vmatprep.subr.bf16.mxu1 %v782_v0 }
  0x5b   : > { %530 = vmatpush3.bf16.msra.mxu0 %v646_v5  ;;  %550 = vmatpush3.bf16.msra.mxu1 %v646_v5 }
  0x5c   : > { %531 = vmatprep.subr.bf16.mxu0 %v782_v0  ;;  %551 = vmatprep.subr.bf16.mxu1 %v782_v0 }
  0x5f   : > { %532 = vmatpush3.bf16.msra.mxu0 %v647_v6  ;;  %552 = vmatpush3.bf16.msra.mxu1 %v647_v6 }
  0x60   : > { %533 = vmatprep.subr.bf16.mxu0 %v782_v0  ;;  %553 = vmatprep.subr.bf16.mxu1 %v782_v0 }
  0x63   : > { %534 = vmatpush3.bf16.msra.mxu0 %v648_v7  ;;  %554 = vmatpush3.bf16.msra.mxu1 %v648_v7 }
  0x64   : > { %535 = vmatprep.subr.bf16.mxu0 %v782_v0  ;;  %555 = vmatprep.subr.bf16.mxu1 %v782_v0 }
  0x67   : > { %536 = vmatpush3.bf16.msra.mxu0 %v649_v8  ;;  %556 = vmatpush3.bf16.msra.mxu1 %v649_v8 }
  0x68   : > { %561 = vmatprep.subr.bf16.mxu0 %v782_v0 }
  0x6a   : > { %538 = vmatmul.mubr.bf16.vlgmr.msra.gmra.mxu0 %v192_v10 }
  0x6b   : > { %562 = vmatpush3.bf16.msra.mxu0 %v642_v1  ;;  %577 = vmatprep.mubr.msk.bf16.mxu0 %vm783_vm0, %v782_v0 }
  0x6c   : > { %563 = vmatprep.subr.bf16.mxu0 %v782_v0 }
  0x6f   : > { %564 = vmatpush3.bf16.msra.mxu0 %v643_v2 }
  0x70   : > { %565 = vmatprep.subr.bf16.mxu0 %v782_v0 }
  0x73   : > { %566 = vmatpush3.bf16.msra.mxu0 %v644_v3 }
  0x74   : > { %567 = vmatprep.subr.bf16.mxu0 %v782_v0 }
  0x77   : > { %568 = vmatpush3.bf16.msra.mxu0 %v645_v4 }
  0x78   : > { %569 = vmatprep.subr.bf16.mxu0 %v782_v0 }
  0x7b   : > { %570 = vmatpush3.bf16.msra.mxu0 %v646_v5 }
  0x7c   : > { %571 = vmatprep.subr.bf16.mxu0 %v782_v0 }
  0x7f   : > { %572 = vmatpush3.bf16.msra.mxu0 %v647_v6 }
  0x80   : > { %573 = vmatprep.subr.bf16.mxu0 %v782_v0 }
  0x83   : > { %574 = vmatpush3.bf16.msra.mxu0 %v648_v7 }
  0x84   : > { %575 = vmatprep.subr.bf16.mxu0 %v782_v0 }
  0x87   : > { %576 = vmatpush3.bf16.msra.mxu0 %v649_v8 }
 0x12a   : > { %v275_v11 = vpop.f32.mrf.mxu0 }
 0x12b   : > { %v281_v12 = vmul.f32 0.125, %v275_v11 }
 0x12c   : > { %v539_v13 = vpop.f32.mrf.mxu0 }
 0x12d   : > { %v282_v14 = vsub.f32 %v175_v9, %v281_v12 }
 0x12e   : > { %v278_v15 = vpop.f32.mrf.mxu0 }
 0x12f   : > { %v283_v16 = vmul.f32 1.442695, %v282_v14 }
 0x130   : > { %v540_v17 = vpop.f32.mrf.mxu0 }
 0x131   : > { %650 = vpow2.f32 %v283_v16 }
 0x13e   : > { %v651_v18 = vpop.eup %650 }
 0x13f   : > { %v285_v19 = vpack.c.bf16 %v651_v18, %v651_v18 }
 0x141   : > { %578 = vmatmul.mubr.bf16.vlgmr.msra.gmra.mxu0 %v285_v19  ;;  %v286_v20 = vunpack.c.l.bf16 %v285_v19 }
 0x143   : > { %v287_v21 = vsub.f32 %v651_v18, %v286_v20 }
 0x145   : > { %v288_v22 = vpack.c.bf16 %v287_v21, %v287_v21 }
 0x147   : > { %558 = vmatmul.mubr.bf16.vlgmr.msra.gmra.mxu1 %v288_v22 }
 0x201   : > { %v363_v23 = vpop.f32.mrf.mxu0 }
 0x203   : > { %v579_v24 = vpop.f32.mrf.mxu0 }
 0x205   : > { %v366_v25 = vpop.f32.mrf.mxu0 }
 0x207   : > { %v323_v26 = vpop.f32.mrf.mxu1  ;;  %v580_v27 = vpop.f32.mrf.mxu0 }
 0x208   : > { %v364_v28 = vadd.f32 %v363_v23, %v323_v26 }
 0x209   : > { %v559_v29 = vpop.f32.mrf.mxu1 }
 0x20a   : > { %652 = vrcp.f32 %v364_v28 }
 0x20b   : > { %v326_v30 = vpop.f32.mrf.mxu1 }
 0x20d   : > { %v560_v31 = vpop.f32.mrf.mxu1 }
 0x217   : > { %v653_v32 = vpop.eup %652 }
 0x218   : > { %v370_v33 = vmul.f32 %v653_v32, %v364_v28 }
 0x21a   : > { %v371_v34 = vsub.f32 2.0, %v370_v33 }
 0x21c   : > { %v372_v35 = vmul.f32 %v653_v32, %v371_v34 }
 0x21e   : > { %v373_v36 = vmul.f32 %v372_v35, %v364_v28 }
 0x220   : > { %v374_v37 = vsub.f32 2.0, %v373_v36 }
 0x222   : > { %v375_v38 = vmul.f32 %v374_v37, %v372_v35 }
 0x224   : > { %v376_v39 = vmul.f32 %v651_v18, %v375_v38 }
 0x226   : > { %377 = vst [vmem:[%s173_s17] sm:$0xff] %v376_v39 }
 0x227   : > { %721 = shalt.err (!%p718_p0)
}
 0x228   : > { %s722_s27 = scalar_lea.hbm %s390_s20, 128  ;;  %s726_s4 = scalar_lea.hbm %s964_s2, 512 }
 0x229   : > { %p723_p5 = scmp.ne.s32.totalorder %s390_s20, %s722_s27  ;;  %p727_p1 = scmp.lt.s32.totalorder %s390_s20, %s964_s2 }
 0x22a   : > { %p728_p4 = scmp.lt.s32.totalorder %s726_s4, %s722_s27 }
 0x22b   : > { %p724_p9 = pnand %p723_p5, %p980_p3 }
 0x22c   : > { %p729_p6 = por %p728_p4, %p727_p1 }
 0x22d   : > { %p725_p11 = pneg %p724_p9 }
 0x22f   : > { %p730_p8 = pnand %p729_p6, %p725_p11 }
 0x231   : > { %733 = shalt.err (!%p730_p8)
}
 0x232   : > { %587 = dma.vmem_to_hbm [thread:$0]  (%p980_p3), %s393_s8, 128, %s390_s20, %s379_s23  }
 0x233 PF: > { %p604_p10 = scmp.ge.s32.totalorder %s776_s12, 2  ;;  %s404_s7 = sand.u32 1, %s764_s9  }
 0x234   : > { %p981_p7 = scmp.ne.s32.totalorder %s970_s16, 0  ;;  %s405_s14 = scalar_lea.sflag [#allocation4], %s404_s7 }
 0x236   : > { %p598_p12 = pnand %p604_p10, %p981_p7 }
 0x238   : > { %p599_p2 = pneg %p598_p12 }
 0x23a   : > { %759 = dma.done.wait (%p599_p2), %s405_s14, 128  }
 0x23b   : > { %761 = vsyncadd (%p599_p2), %s405_s14, 4294967168  ;;  %p16_p13 = scmp.ge.s32.totalorder %s853_s21, 6   ;;  %s982_s9 = smov %s768_s10 }
 0x23c   : > { %s983_s10 = smov %s772_s11  ;;  %s984_s11 = smov %s870_s29 }
 0x23d   : > { %s985_s12 = smov %s853_s21  ;;  %18 = sbr.rel (!%p16_p13) target bundleno = 6 (0x6), region = 77 }
 0x242   :  { %410 = vsyncpa [#allocation3], 1 }
 0x243   :  { %412 = vsyncpa [#allocation3 + $0x1], 1 }
 0x244   :  { %413 = vsyncpa [#allocation6], 1 }
 0x245   :  { %414 = vsyncpa [#allocation4], 1 }
 0x246   :  { %416 = vsyncpa [#allocation4 + $0x1], 1 }

</bundles_post_ra>
